<compile_context>
chip_gen: v7x
topology: tpu7x:2x2x1
jax: 0.10.0
libtpu: 0.0.40
codegen_flags: <defaults>
</compile_context>

<pallas_src>
import functools

import jax
import jax.numpy as jnp
from jax.experimental import pallas as pl
from jax.experimental.pallas import tpu as pltpu


def _int_pow(x, n: int):
    """x**n for a static positive integer n, via exponentiation-by-squaring (VPU only)."""
    acc = None
    base = x
    while n > 0:
        if n & 1:
            acc = base if acc is None else acc * base
        n >>= 1
        if n:
            base = base * base
    return acc


def _g2pool_kernel(p_ref, alpha_ref, beta_ref, x_ref, o_ref, *, eps, inv_hw, static_p):
    # p_ref/alpha_ref/beta_ref: (1,) f32 in SMEM (scalar path).
    # x_ref: (TR, HW) VMEM tile (rows = flattened B*C, lanes = HW).
    # o_ref: (TR, 1) VMEM tile.
    alpha = alpha_ref[0]
    beta = beta_ref[0]

    # Upcast to f32 so log/exp and the mean accumulation stay accurate for bf16 inputs.
    x = x_ref[...].astype(jnp.float32)              # (TR, HW)
    xc = jnp.maximum(x, eps)                        # clamp(min=eps); keeps log well-defined

    if static_p is not None:
        # Frozen integer p: pure VPU multiplies, frees the single EUP slot.
        xp = _int_pow(xc, static_p)
        inv_p = 1.0 / float(static_p)
    else:
        # General learnable p: x^p = exp(p * log(x)) on the EUP.
        p = p_ref[0]
        xp = jnp.exp(p * jnp.log(xc))
        inv_p = 1.0 / p

    # Mean over H*W (f32 accumulation), then the p-th root.
    pooled = jnp.sum(xp, axis=-1, keepdims=True) * inv_hw      # (TR, 1)
    # Floor against eps^p underflow (pooled == 0 would give log(0) = -inf).
    pooled = jnp.maximum(pooled, 1e-37)
    gem = jnp.exp(inv_p * jnp.log(pooled))                     # pooled^(1/p)

    o_ref[...] = (alpha * gem + beta).astype(o_ref.dtype)


def g2_pooling(x, p, alpha, beta, eps=1e-6, static_p=None,
               tile_budget_bytes=2 * 1024 * 1024):
    """x: (B, C, H, W).  p, alpha, beta: (1,) f32.  Returns (B, C, 1, 1).

    static_p: optional Python int. If given, x^p is specialized to integer
    multiplies (must equal the value stored in `p` for matching results).
    """
    B, C, H, W = x.shape
    N = B * C
    HW = H * W
    itemsize = jnp.dtype(x.dtype).itemsize

    if static_p is not None:
        static_p = int(static_p)
        if not (1 <= static_p <= 16):
            raise ValueError("static_p must be a small positive integer")

    # Flat 2-D view: rows = B*C (sublanes), HW on lanes. Free reshape (contiguous).
    x2 = x.reshape(N, HW)

    # Row tile TR from a per-step VMEM budget (~2 MiB hits the HBM-roofline knee
    # on v5e/v6e/v7x). Single step when everything fits; otherwise TR is a
    # multiple of 8 (sublane granularity) and the ragged last block is handled
    # by Pallas (clipped reads / masked writes, garbage rows never stored).
    row_bytes = HW * itemsize
    rows_budget = max(1, tile_budget_bytes // row_bytes)
    if N <= rows_budget:
        TR = N                                   # block == full array dims
    else:
        TR = max(8, (rows_budget // 8) * 8)
    grid_n = pl.cdiv(N, TR)

    # VMEM limit from the real footprint: double-buffered input tile + a few f32
    # elementwise temporaries + output + headroom (kept well under v7x's 64 MiB).
    tile_in_bytes = TR * HW * itemsize
    tile_f32_bytes = TR * HW * 4
    vmem_limit = 2 * tile_in_bytes + 4 * tile_f32_bytes + 2 * TR * 4 + (2 << 20)
    vmem_limit = int(min(max(vmem_limit, 8 << 20), 32 << 20))

    kernel = functools.partial(
        _g2pool_kernel, eps=float(eps), inv_hw=1.0 / float(HW), static_p=static_p)

    transcendentals = (2 * N if static_p is not None
                       else 2 * N * HW + 2 * N)
    cost = pl.CostEstimate(
        flops=4 * N * HW + 4 * N,
        transcendentals=transcendentals,
        bytes_accessed=N * HW * itemsize + N * itemsize + 3 * 4,
    )

    out = pl.pallas_call(
        kernel,
        out_shape=jax.ShapeDtypeStruct((N, 1), x.dtype),
        grid=(grid_n,),
        in_specs=[
            pl.BlockSpec(memory_space=pltpu.MemorySpace.SMEM),   # p
            pl.BlockSpec(memory_space=pltpu.MemorySpace.SMEM),   # alpha
            pl.BlockSpec(memory_space=pltpu.MemorySpace.SMEM),   # beta
            pl.BlockSpec((TR, HW), lambda i: (i, 0)),            # x row tile (lane-dense)
        ],
        out_specs=pl.BlockSpec((TR, 1), lambda i: (i, 0)),
        compiler_params=pltpu.CompilerParams(
            dimension_semantics=("parallel",),
            vmem_limit_bytes=vmem_limit,
        ),
        cost_estimate=cost,
    )(p, alpha, beta, x2)

    return out.reshape(B, C, 1, 1)


def g2_pooling_ref(x, p, alpha, beta, eps=1e-6):
    """Pure-JAX reference mirroring the PyTorch G2Pooling forward."""
    ps = p[0]
    gem = jnp.mean(jnp.maximum(x, eps) ** ps, axis=(2, 3), keepdims=True) ** (1.0 / ps)
    return alpha[0] * gem + beta[0]


if __name__ == "__main__":
    # Small shapes consistent with the module: pooling over a (16, 16) spatial map.
    B, C, H, W = 2, 32, 16, 16

    key = jax.random.PRNGKey(0)
    x = jax.random.normal(key, (B, C, H, W), dtype=jnp.float32)

    # Learnable parameters (module init p=3, perturbed affine to exercise alpha/beta).
    p = jnp.array([3.0], dtype=jnp.float32)
    alpha = jnp.array([1.25], dtype=jnp.float32)
    beta = jnp.array([-0.1], dtype=jnp.float32)

    ref = g2_pooling_ref(x, p, alpha, beta)

    # General learnable-p path (EUP log/exp).
    out_general = jax.block_until_ready(g2_pooling(x, p, alpha, beta))
    # Static integer-p specialization (VPU multiplies), matching p = 3.
    out_static = jax.block_until_ready(g2_pooling(x, p, alpha, beta, static_p=3))

    assert out_general.shape == (B, C, 1, 1)
    assert out_static.shape == (B, C, 1, 1)
    assert jnp.allclose(out_general, ref, atol=1e-4, rtol=1e-4), "general path mismatch"
    assert jnp.allclose(out_static, ref, atol=1e-4, rtol=1e-4), "static-p path mismatch"

    print("KERNEL_OK")
</pallas_src>

<mosaic_0001>
module attributes {stable_mosaic.version = 11 : i64} {
  func.func @_g2pool_kernel(%arg0: i32, %arg1: memref<1xf32, #tpu.memory_space<smem>>, %arg2: memref<1xf32, #tpu.memory_space<smem>>, %arg3: memref<1xf32, #tpu.memory_space<smem>>, %arg4: memref<64x256xf32, #tpu.memory_space<vmem>>, %arg5: memref<64x1xf32, #tpu.memory_space<vmem>>) attributes {dimension_semantics = [#tpu.dimension_semantics<parallel>], iteration_bounds = array<i64: 1>, scalar_prefetch = 0 : i64, scratch_operands = 0 : i64, tpu.core_type = #tpu.core_type<tc>, window_params = [{transform_indices = @transform_0, window_bounds = array<i64: 1>}, {transform_indices = @transform_1, window_bounds = array<i64: 1>}, {transform_indices = @transform_2, window_bounds = array<i64: 1>}, {transform_indices = @transform_3, window_bounds = array<i64: 64, 256>}, {transform_indices = @transform_4, window_bounds = array<i64: 64, 1>}]} {
    %c0 = arith.constant 0 : index
    %0 = memref.load %arg2[%c0] : memref<1xf32, #tpu.memory_space<smem>>
    %c0_0 = arith.constant 0 : index
    %1 = memref.load %arg3[%c0_0] : memref<1xf32, #tpu.memory_space<smem>>
    %c0_1 = arith.constant 0 : index
    %c0_2 = arith.constant 0 : index
    %2 = vector.load %arg4[%c0_1, %c0_2] : memref<64x256xf32, #tpu.memory_space<vmem>>, vector<64x256xf32>
    %cst = arith.constant 9.99999997E-7 : f32
    %3 = vector.broadcast %cst : f32 to vector<64x256xf32>
    %4 = arith.maximumf %2, %3 : vector<64x256xf32>
    %c0_3 = arith.constant 0 : index
    %5 = memref.load %arg1[%c0_3] : memref<1xf32, #tpu.memory_space<smem>>
    %6 = math.log %4 : vector<64x256xf32>
    %7 = vector.broadcast %5 : f32 to vector<64x256xf32>
    %8 = arith.mulf %7, %6 : vector<64x256xf32>
    %9 = math.exp %8 : vector<64x256xf32>
    %cst_4 = arith.constant 1.000000e+00 : f32
    %10 = arith.divf %cst_4, %5 : f32
    %cst_5 = arith.constant dense<0.000000e+00> : vector<64xf32>
    %11 = vector.multi_reduction <add>, %9, %cst_5 [1] : vector<64x256xf32> to vector<64xf32>
    %12 = vector.shape_cast %11 : vector<64xf32> to vector<64x1xf32>
    %cst_6 = arith.constant 3.906250e-03 : f32
    %13 = vector.broadcast %cst_6 : f32 to vector<64x1xf32>
    %14 = arith.mulf %12, %13 : vector<64x1xf32>
    %cst_7 = arith.constant 9.99999991E-38 : f32
    %15 = vector.broadcast %cst_7 : f32 to vector<64x1xf32>
    %16 = arith.maximumf %14, %15 : vector<64x1xf32>
    %17 = math.log %16 : vector<64x1xf32>
    %18 = vector.broadcast %10 : f32 to vector<64x1xf32>
    %19 = arith.mulf %18, %17 : vector<64x1xf32>
    %20 = math.exp %19 : vector<64x1xf32>
    %21 = vector.broadcast %0 : f32 to vector<64x1xf32>
    %22 = arith.mulf %21, %20 : vector<64x1xf32>
    %23 = vector.broadcast %1 : f32 to vector<64x1xf32>
    %24 = arith.addf %22, %23 : vector<64x1xf32>
    %c0_8 = arith.constant 0 : index
    %c0_9 = arith.constant 0 : index
    %25 = vector.load %arg5[%c0_8, %c0_9] : memref<64x1xf32, #tpu.memory_space<vmem>>, vector<64x1xf32>
    tpu.vector_store %arg5[%c0_8, %c0_9], %24 {strides = array<i32>} : memref<64x1xf32, #tpu.memory_space<vmem>>, vector<64x1xf32>,
    return
  }
  func.func @transform_0(%arg0: i32) -> i32 {
    %c0_i32 = arith.constant 0 : i32
    %c0_i32_0 = arith.constant 0 : i32
    return %c0_i32 : i32
  }
  func.func @transform_1(%arg0: i32) -> i32 {
    %c0_i32 = arith.constant 0 : i32
    %c0_i32_0 = arith.constant 0 : i32
    return %c0_i32 : i32
  }
  func.func @transform_2(%arg0: i32) -> i32 {
    %c0_i32 = arith.constant 0 : i32
    %c0_i32_0 = arith.constant 0 : i32
    return %c0_i32 : i32
  }
  func.func @transform_3(%arg0: i32) -> (i32, i32) {
    %c0_i32 = arith.constant 0 : i32
    %c0_i32_0 = arith.constant 0 : i32
    return %arg0, %c0_i32 : i32, i32
  }
  func.func @transform_4(%arg0: i32) -> (i32, i32) {
    %c0_i32 = arith.constant 0 : i32
    %c0_i32_0 = arith.constant 0 : i32
    return %arg0, %c0_i32 : i32, i32
  }
}

</mosaic_0001>

<bundles_post_ra>
// kernel: tpu_custom_call.1
= control target key start
LH: loop header
LB: loop body
LE: loop exit
PB: predicated region body
PF: predicated region fallthrough
CT: control target
= control target key end

     0   :  { %12 = vsyncpa [#allocation6], 0  ;;  %s393_s15 = smov [#allocation5]   ;;  %s493_s0 = inlined_call_operand.<no memory space> [shape: f32[1], index: 0, kind: input, shape index: {}]   ;;  %s494_s1 = inlined_call_operand.<no memory space> [shape: f32[1], index: 1, kind: input, shape index: {}]   ;;  %s495_s2 = inlined_call_operand.<no memory space> [shape: f32[1], index: 2, kind: input, shape index: {}]   ;;  %s496_s3 = inlined_call_operand.hbm [shape: f32[64,256], index: 3, kind: input, shape index: {}]   ;;  %s497_s4 = inlined_call_operand.vmem [shape: f32[64,1], index: 4, kind: output, shape index: {}]  }
   0x1   :  { %s24_s16 = sshll.u32 %s393_s15, 4  ;;  %s369_s19 = scalar_lea.hbm %s496_s3, 2048  ;;  %s25_s16 = int_to_ptr.vmem [resolvable:$true] %s24_s16 }
   0x2   :  { %p370_p0 = scmp.ne.s32.totalorder %s496_s3, %s369_s19  ;;  %p373_p1 = scmp.lt.u32.totalorder %s369_s19, %s496_s3 }
   0x4   :  { %p375_p2 = pnand %p373_p1, %p370_p0 }
   0x6   :  { %378 = shalt.err (!%p375_p2)
}
   0x7   :  { %s379_s24 = scalar_lea.vmem %s25_s16, 2048  ;;  %p384_p4 = scmp.lt.s32.totalorder %s25_s16, %s25_s16 }
   0x8   :  { %p380_p3 = scmp.ne.s32.totalorder %s25_s16, %s379_s24  ;;  %p385_p5 = scmp.lt.s32.totalorder %s379_s24, %s379_s24 }
   0xa   :  { %p386_p6 = por %p385_p5, %p384_p4 }
   0xc   :  { %p387_p7 = pnand %p386_p6, %p380_p3 }
   0xe   :  { %390 = shalt.err (!%p387_p7)
}
   0xf   :  { %s394_s25 = smov 256   ;;  %s395_s26 = smov 16  }
  0x10   :  { %30 = dma.hbm_to_vmem [thread:$0]  %s496_s3, 2048, %s25_s16, [#allocation6], %s394_s25, %s394_s25, %s395_s26  }
  0x11   :  { %391 = dma.done.wait [#allocation6], 2048  }
  0x12   :  { %392 = vsyncadd [#allocation6], 4294965248  ;;  %v436_v0 = vstv %s493_s0  ;;  %v40_v1 = vld [vmem:[#allocation5 + $0x20] sm:$0xff]  ;;  %v41_v2 = vld [vmem:[#allocation5 + $0x28] sm:$0xff]  ;;  %vm252_vm0 = vcmask 7168  }
  0x13   :  { %271 = vrcp.f32 %v436_v0  ;;  %v36_v3 = vld [vmem:[#allocation5] sm:$0xff]  ;;  %v56_v4 = vmax.f32 %v40_v1, 1e-06  ;;  %v57_v5 = vmax.f32 %v41_v2, 1e-06  ;;  %v37_v6 = vld [vmem:[#allocation5 + $0x8] sm:$0xff] }
  0x14   :  { %v42_v7 = vld [vmem:[#allocation5 + $0x30] sm:$0xff]  ;;  %v52_v8 = vmax.f32 %v36_v3, 1e-06  ;;  %v53_v9 = vmax.f32 %v37_v6, 1e-06  ;;  %v43_v10 = vld [vmem:[#allocation5 + $0x38] sm:$0xff] }
  0x15   :  { %v38_v11 = vld [vmem:[#allocation5 + $0x10] sm:$0xff]  ;;  %273 = vlog2.f32 %v56_v4  ;;  %v58_v12 = vmax.f32 %v42_v7, 1e-06  ;;  %v39_v13 = vld [vmem:[#allocation5 + $0x18] sm:$0xff]  ;;  %v59_v15 = vmax.f32 %v43_v10, 1e-06 }
  0x16   :  { %275 = vlog2.f32 %v57_v5  ;;  %v46_v16 = vld [vmem:[#allocation5 + $0x50] sm:$0xff]  ;;  %v54_v17 = vmax.f32 %v38_v11, 1e-06  ;;  %v47_v18 = vld [vmem:[#allocation5 + $0x58] sm:$0xff]  ;;  %v55_v19 = vmax.f32 %v39_v13, 1e-06 }
  0x17   :  { %277 = vlog2.f32 %v52_v8  ;;  %v44_v20 = vld [vmem:[#allocation5 + $0x40] sm:$0xff]  ;;  %v62_v21 = vmax.f32 %v46_v16, 1e-06  ;;  %v45_v22 = vld [vmem:[#allocation5 + $0x48] sm:$0xff]  ;;  %v63_v23 = vmax.f32 %v47_v18, 1e-06 }
  0x18   :  { %279 = vlog2.f32 %v53_v9  ;;  %v50_v24 = vld [vmem:[#allocation5 + $0x70] sm:$0xff]  ;;  %v60_v25 = vmax.f32 %v44_v20, 1e-06  ;;  %v51_v26 = vld [vmem:[#allocation5 + $0x78] sm:$0xff]  ;;  %v61_v27 = vmax.f32 %v45_v22, 1e-06 }
  0x19   :  { %281 = vlog2.f32 %v58_v12  ;;  %v48_v28 = vld [vmem:[#allocation5 + $0x60] sm:$0xff]  ;;  %v66_v29 = vmax.f32 %v50_v24, 1e-06  ;;  %v49_v30 = vld [vmem:[#allocation5 + $0x68] sm:$0xff]  ;;  %v67_v31 = vmax.f32 %v51_v26, 1e-06 }
  0x1a   :  { %283 = vlog2.f32 %v59_v15  ;;  %v64_v33 = vmax.f32 %v48_v28, 1e-06  ;;  %v65_v36 = vmax.f32 %v49_v30, 1e-06 }
  0x1b   :  { %285 = vlog2.f32 %v54_v17 }
  0x1c   :  { %287 = vlog2.f32 %v55_v19 }
  0x1d   :  { %v272_v14 = vpop.eup %271  ;;  %289 = vlog2.f32 %v62_v21 }
  0x1e   :  { %266 = vpush %v272_v14  ;;  %291 = vlog2.f32 %v63_v23 }
  0x1f   :  { %v274_v32 = vpop.eup %273  ;;  %293 = vlog2.f32 %v60_v25 }
  0x20   :  { %v276_v34 = vpop.eup %275  ;;  %v78_v35 = vmul.f32 0.6931472, %v274_v32  ;;  %295 = vlog2.f32 %v61_v27 }
  0x21   :  { %v278_v37 = vpop.eup %277  ;;  %v80_v38 = vmul.f32 0.6931472, %v276_v34  ;;  %297 = vlog2.f32 %v66_v29 }
  0x22   :  { %v280_v39 = vpop.eup %279  ;;  %v106_v40 = vmul.f32 %v436_v0, %v78_v35  ;;  %v70_v41 = vmul.f32 0.6931472, %v278_v37  ;;  %299 = vlog2.f32 %v67_v31 }
  0x23   :  { %v282_v42 = vpop.eup %281  ;;  %v107_v43 = vmul.f32 %v436_v0, %v80_v38  ;;  %v72_v44 = vmul.f32 0.6931472, %v280_v39  ;;  %301 = vlog2.f32 %v64_v33 }
  0x24   :  { %v284_v45 = vpop.eup %283  ;;  %v126_v46 = vmul.f32 1.442695, %v106_v40  ;;  %v102_v47 = vmul.f32 %v436_v0, %v70_v41  ;;  %v82_v48 = vmul.f32 0.6931472, %v282_v42  ;;  %303 = vlog2.f32 %v65_v36 }
  0x25   :  { %v286_v49 = vpop.eup %285  ;;  %v128_v50 = vmul.f32 1.442695, %v107_v43  ;;  %v103_v51 = vmul.f32 %v436_v0, %v72_v44  ;;  %v84_v52 = vmul.f32 0.6931472, %v284_v45 }
  0x26   :  { %v288_v53 = vpop.eup %287  ;;  %305 = vpow2.f32 %v126_v46  ;;  %v118_v54 = vmul.f32 1.442695, %v102_v47  ;;  %v108_v55 = vmul.f32 %v436_v0, %v82_v48  ;;  %v74_v56 = vmul.f32 0.6931472, %v286_v49 }
  0x27   :  { %v290_v57 = vpop.eup %289  ;;  %307 = vpow2.f32 %v128_v50  ;;  %v120_v58 = vmul.f32 1.442695, %v103_v51  ;;  %v109_v59 = vmul.f32 %v436_v0, %v84_v52  ;;  %v76_v60 = vmul.f32 0.6931472, %v288_v53 }
  0x28   :  { %v292_v61 = vpop.eup %291  ;;  %309 = vpow2.f32 %v118_v54  ;;  %v130_v62 = vmul.f32 1.442695, %v108_v55  ;;  %v104_v63 = vmul.f32 %v436_v0, %v74_v56  ;;  %v90_v1 = vmul.f32 0.6931472, %v290_v57 }
  0x29   :  { %v294_v2 = vpop.eup %293  ;;  %311 = vpow2.f32 %v120_v58  ;;  %v132_v3 = vmul.f32 1.442695, %v109_v59  ;;  %v105_v4 = vmul.f32 %v436_v0, %v76_v60  ;;  %v92_v5 = vmul.f32 0.6931472, %v292_v61 }
  0x2a   :  { %v296_v6 = vpop.eup %295  ;;  %313 = vpow2.f32 %v130_v62  ;;  %v122_v7 = vmul.f32 1.442695, %v104_v63  ;;  %v112_v8 = vmul.f32 %v436_v0, %v90_v1  ;;  %v86_v9 = vmul.f32 0.6931472, %v294_v2 }
  0x2b   :  { %v298_v10 = vpop.eup %297  ;;  %315 = vpow2.f32 %v132_v3  ;;  %v124_v11 = vmul.f32 1.442695, %v105_v4  ;;  %v113_v12 = vmul.f32 %v436_v0, %v92_v5  ;;  %v88_v13 = vmul.f32 0.6931472, %v296_v6 }
  0x2c   :  { %v300_v14 = vpop.eup %299  ;;  %317 = vpow2.f32 %v122_v7  ;;  %v138_v15 = vmul.f32 1.442695, %v112_v8  ;;  %v110_v16 = vmul.f32 %v436_v0, %v86_v9  ;;  %v98_v17 = vmul.f32 0.6931472, %v298_v10 }
  0x2d   :  { %v302_v18 = vpop.eup %301  ;;  %319 = vpow2.f32 %v124_v11  ;;  %v140_v19 = vmul.f32 1.442695, %v113_v12  ;;  %v111_v20 = vmul.f32 %v436_v0, %v88_v13  ;;  %v100_v21 = vmul.f32 0.6931472, %v300_v14 }
  0x2e   :  { %v304_v22 = vpop.eup %303  ;;  %321 = vpow2.f32 %v138_v15  ;;  %v134_v23 = vmul.f32 1.442695, %v110_v16  ;;  %v116_v24 = vmul.f32 %v436_v0, %v98_v17  ;;  %v94_v25 = vmul.f32 0.6931472, %v302_v18 }
  0x2f   :  { %323 = vpow2.f32 %v140_v19  ;;  %v136_v26 = vmul.f32 1.442695, %v111_v20  ;;  %v117_v27 = vmul.f32 %v436_v0, %v100_v21  ;;  %v96_v28 = vmul.f32 0.6931472, %v304_v22 }
  0x30   :  { %v306_v29 = vpop.eup %305  ;;  %325 = vpow2.f32 %v134_v23  ;;  %v146_v30 = vmul.f32 1.442695, %v116_v24  ;;  %v114_v31 = vmul.f32 %v436_v0, %v94_v25 }
  0x31   :  { %v308_v32 = vpop.eup %307  ;;  %327 = vpow2.f32 %v136_v26  ;;  %v148_v33 = vmul.f32 1.442695, %v117_v27  ;;  %v115_v34 = vmul.f32 %v436_v0, %v96_v28 }
  0x32   :  { %v310_v35 = vpop.eup %309  ;;  %v159_v36 = vadd.f32 %v308_v32, %v306_v29  ;;  %329 = vpow2.f32 %v146_v30  ;;  %v142_v37 = vmul.f32 1.442695, %v114_v31 }
  0x33   :  { %v312_v38 = vpop.eup %311  ;;  %331 = vpow2.f32 %v148_v33  ;;  %v144_v39 = vmul.f32 1.442695, %v115_v34 }
  0x34   :  { %v314_v40 = vpop.eup %313  ;;  %160 = vadd.xlane.f32.xlu1 %v159_v36  ;;  %v153_v41 = vadd.f32 %v312_v38, %v310_v35  ;;  %333 = vpow2.f32 %v142_v37 }
  0x35   :  { %v316_v42 = vpop.eup %315  ;;  %335 = vpow2.f32 %v144_v39 }
  0x36   :  { %v318_v43 = vpop.eup %317  ;;  %154 = vadd.xlane.f32.xlu0 %v153_v41  ;;  %v162_v44 = vadd.f32 %v316_v42, %v314_v40 }
  0x37   :  { %v320_v45 = vpop.eup %319 }
  0x38   :  { %v322_v46 = vpop.eup %321  ;;  %163 = vadd.xlane.f32.xlu1 %v162_v44  ;;  %v156_v0 = vadd.f32 %v320_v45, %v318_v43 }
  0x39   :  { %v324_v47 = vpop.eup %323 }
  0x3a   :  { %v326_v48 = vpop.eup %325  ;;  %157 = vadd.xlane.f32.xlu0 %v156_v0  ;;  %v168_v49 = vadd.f32 %v324_v47, %v322_v46  ;;  %v234_v46 = vstv %s494_s1 }
  0x3b   :  { %v328_v50 = vpop.eup %327 }
  0x3c   :  { %v330_v51 = vpop.eup %329  ;;  %169 = vadd.xlane.f32.xlu1 %v168_v49  ;;  %v165_v52 = vadd.f32 %v328_v50, %v326_v48 }
  0x3d   :  { %v332_v53 = vpop.eup %331 }
  0x3e   :  { %v334_v54 = vpop.eup %333  ;;  %166 = vadd.xlane.f32.xlu0 %v165_v52  ;;  %v174_v55 = vadd.f32 %v332_v53, %v330_v51  ;;  %v243_v52 = vstv %s495_s2 }
  0x3f   :  { %v336_v56 = vpop.eup %335 }
  0x40   :  { %175 = vadd.xlane.f32.xlu1 %v174_v55  ;;  %v171_v57 = vadd.f32 %v336_v56, %v334_v54 }
  0x42   :  { %172 = vadd.xlane.f32.xlu0 %v171_v57 }
  0x4f   :  { %s267_s0 = spop %266 }
  0x50   :  { %v209_v19 = vstv %s267_s0 }
  0xc1   :  { %v161_v58 = vpop.xlane.xlu1 %160 }
  0xc2   :  { %v179_v59 = vmul.f32 0.00390625, %v161_v58 }
  0xc3   :  { %v155_v60 = vpop.xlane.xlu0 %154 }
  0xc4   :  { %v187_v61 = vmax.f32 %v179_v59, 1e-37  ;;  %v177_v62 = vmul.f32 0.00390625, %v155_v60 }
  0xc5   :  { %v164_v63 = vpop.xlane.xlu1 %163 }
  0xc6   :  { %337 = vlog2.f32 %v187_v61  ;;  %v185_v1 = vmax.f32 %v177_v62, 1e-37  ;;  %v180_v2 = vmul.f32 0.00390625, %v164_v63 }
  0xc7   :  { %v158_v3 = vpop.xlane.xlu0 %157 }
  0xc8   :  { %339 = vlog2.f32 %v185_v1  ;;  %v188_v4 = vmax.f32 %v180_v2, 1e-37  ;;  %v178_v5 = vmul.f32 0.00390625, %v158_v3 }
  0xc9   :  { %v170_v6 = vpop.xlane.xlu1 %169 }
  0xca   :  { %341 = vlog2.f32 %v188_v4  ;;  %v186_v7 = vmax.f32 %v178_v5, 1e-37  ;;  %v182_v8 = vmul.f32 0.00390625, %v170_v6 }
  0xcb   :  { %v167_v9 = vpop.xlane.xlu0 %166 }
  0xcc   :  { %343 = vlog2.f32 %v186_v7  ;;  %v190_v10 = vmax.f32 %v182_v8, 1e-37  ;;  %v181_v11 = vmul.f32 0.00390625, %v167_v9 }
  0xcd   :  { %v176_v12 = vpop.xlane.xlu1 %175 }
  0xce   :  { %345 = vlog2.f32 %v190_v10  ;;  %v189_v13 = vmax.f32 %v181_v11, 1e-37  ;;  %v184_v14 = vmul.f32 0.00390625, %v176_v12 }
  0xcf   :  { %v173_v15 = vpop.xlane.xlu0 %172 }
  0xd0   :  { %v338_v16 = vpop.eup %337  ;;  %347 = vlog2.f32 %v189_v13  ;;  %v192_v17 = vmax.f32 %v184_v14, 1e-37  ;;  %v183_v18 = vmul.f32 0.00390625, %v173_v15 }
  0xd1   :  { %v198_v20 = vmul.f32 0.6931472, %v338_v16 }
  0xd2   :  { %v340_v21 = vpop.eup %339  ;;  %349 = vlog2.f32 %v192_v17  ;;  %v191_v22 = vmax.f32 %v183_v18, 1e-37 }
  0xd3   :  { %v194_v23 = vmul.f32 0.6931472, %v340_v21  ;;  %v212_v24 = vmul.f32 %v209_v19, %v198_v20 }
  0xd4   :  { %v342_v25 = vpop.eup %341  ;;  %351 = vlog2.f32 %v191_v22 }
  0xd5   :  { %v200_v26 = vmul.f32 0.6931472, %v342_v25  ;;  %v210_v27 = vmul.f32 %v209_v19, %v194_v23  ;;  %v222_v28 = vmul.f32 1.442695, %v212_v24 }
  0xd6   :  { %v344_v29 = vpop.eup %343 }
  0xd7   :  { %v196_v30 = vmul.f32 0.6931472, %v344_v29  ;;  %v213_v31 = vmul.f32 %v209_v19, %v200_v26  ;;  %v218_v32 = vmul.f32 1.442695, %v210_v27  ;;  %353 = vpow2.f32 %v222_v28 }
  0xd8   :  { %v346_v33 = vpop.eup %345 }
  0xd9   :  { %v204_v34 = vmul.f32 0.6931472, %v346_v33  ;;  %v211_v35 = vmul.f32 %v209_v19, %v196_v30  ;;  %355 = vpow2.f32 %v218_v32  ;;  %v224_v36 = vmul.f32 1.442695, %v213_v31 }
  0xda   :  { %v348_v37 = vpop.eup %347 }
  0xdb   :  { %v202_v38 = vmul.f32 0.6931472, %v348_v37  ;;  %v215_v39 = vmul.f32 %v209_v19, %v204_v34  ;;  %v220_v40 = vmul.f32 1.442695, %v211_v35  ;;  %357 = vpow2.f32 %v224_v36 }
  0xdc   :  { %v350_v41 = vpop.eup %349 }
  0xdd   :  { %v208_v42 = vmul.f32 0.6931472, %v350_v41  ;;  %v214_v43 = vmul.f32 %v209_v19, %v202_v38  ;;  %359 = vpow2.f32 %v220_v40  ;;  %v228_v44 = vmul.f32 1.442695, %v215_v39 }
  0xde   :  { %v352_v45 = vpop.eup %351 }
  0xdf   :  { %v206_v0 = vmul.f32 0.6931472, %v352_v45  ;;  %v217_v47 = vmul.f32 %v209_v19, %v208_v42  ;;  %v226_v48 = vmul.f32 1.442695, %v214_v43  ;;  %361 = vpow2.f32 %v228_v44 }
  0xe1   :  { %v354_v49 = vpop.eup %353  ;;  %v216_v50 = vmul.f32 %v209_v19, %v206_v0  ;;  %363 = vpow2.f32 %v226_v48  ;;  %v232_v51 = vmul.f32 1.442695, %v217_v47 }
  0xe2   :  { %v237_v53 = vmul.f32 %v354_v49, %v234_v46 }
  0xe3   :  { %v356_v54 = vpop.eup %355  ;;  %v230_v55 = vmul.f32 1.442695, %v216_v50  ;;  %365 = vpow2.f32 %v232_v51 }
  0xe4   :  { %v235_v56 = vmul.f32 %v356_v54, %v234_v46  ;;  %v246_v57 = vadd.f32 %v243_v52, %v237_v53 }
  0xe5   :  { %v358_v58 = vpop.eup %357  ;;  %367 = vpow2.f32 %v230_v55 }
  0xe6   :  { %v238_v59 = vmul.f32 %v358_v58, %v234_v46  ;;  %v244_v60 = vadd.f32 %v243_v52, %v235_v56  ;;  %255 = vst.msk [vmem:[%s497_s4 + $0x10] sm:$0xff] %vm252_vm0, %v246_v57 }
  0xe7   :  { %v360_v61 = vpop.eup %359 }
  0xe8   :  { %v236_v62 = vmul.f32 %v360_v61, %v234_v46  ;;  %v247_v63 = vadd.f32 %v243_v52, %v238_v59  ;;  %253 = vst.msk [vmem:[%s497_s4] sm:$0xff] %vm252_vm0, %v244_v60 }
  0xe9   :  { %v362_v1 = vpop.eup %361 }
  0xea   :  { %v240_v2 = vmul.f32 %v362_v1, %v234_v46  ;;  %v245_v3 = vadd.f32 %v243_v52, %v236_v62  ;;  %256 = vst.msk [vmem:[%s497_s4 + $0x18] sm:$0xff] %vm252_vm0, %v247_v63 }
  0xeb   :  { %v364_v4 = vpop.eup %363 }
  0xec   :  { %v239_v5 = vmul.f32 %v364_v4, %v234_v46  ;;  %v249_v6 = vadd.f32 %v243_v52, %v240_v2  ;;  %254 = vst.msk [vmem:[%s497_s4 + $0x8] sm:$0xff] %vm252_vm0, %v245_v3 }
  0xed   :  { %v366_v7 = vpop.eup %365 }
  0xee   :  { %v242_v8 = vmul.f32 %v366_v7, %v234_v46  ;;  %v248_v9 = vadd.f32 %v243_v52, %v239_v5  ;;  %258 = vst.msk [vmem:[%s497_s4 + $0x28] sm:$0xff] %vm252_vm0, %v249_v6 }
  0xef   :  { %v368_v10 = vpop.eup %367 }
  0xf0   :  { %v241_v11 = vmul.f32 %v368_v10, %v234_v46  ;;  %v251_v12 = vadd.f32 %v243_v52, %v242_v8  ;;  %257 = vst.msk [vmem:[%s497_s4 + $0x20] sm:$0xff] %vm252_vm0, %v248_v9 }
  0xf2   :  { %v250_v13 = vadd.f32 %v243_v52, %v241_v11  ;;  %260 = vst.msk [vmem:[%s497_s4 + $0x38] sm:$0xff] %vm252_vm0, %v251_v12 }
  0xf4   :  { %259 = vst.msk [vmem:[%s497_s4 + $0x30] sm:$0xff] %vm252_vm0, %v250_v13 }
  0xf5   :  { %265 = vsyncpa [#allocation6], 1 }

</bundles_post_ra>
